<compile_context>
chip_gen: v7x
topology: tpu7x:2x2x1
jax: 0.10.0
libtpu: 0.0.40
codegen_flags: <defaults>
</compile_context>

<pallas_src>
import jax
import jax.numpy as jnp
from jax.experimental import pallas as pl
from jax.experimental.pallas import tpu as pltpu

EPS = 1e-6


def _layernorm_kernel(alpha_ref, bias_ref, x_ref, o_ref):
    # x_ref: (tile_rows, hidden) in VMEM; alpha/bias: (1,) scalars in SMEM.
    x = x_ref[...].astype(jnp.float32)
    n = x.shape[-1]
    mean = jnp.mean(x, axis=-1, keepdims=True)
    diff = x - mean
    # torch.std is the unbiased (Bessel-corrected, ddof=1) estimator.
    # TODO(synk): for hidden == 1 torch.std(ddof=1) returns NaN; here it is 0.
    var = jnp.sum(diff * diff, axis=-1, keepdims=True) / jnp.float32(max(n - 1, 1))
    std = jnp.sqrt(var)
    # One exact divide per ROW; fold alpha into the per-row scale and bias/mean
    # into a per-row offset so the tile-wide work is a single fused mul+add.
    inv = 1.0 / (std + jnp.float32(EPS))                        # (tile_rows, 1)
    scale = alpha_ref[0].astype(jnp.float32) * inv              # (tile_rows, 1)
    offset = bias_ref[0].astype(jnp.float32) - mean * scale     # (tile_rows, 1)
    o_ref[...] = (x * scale + offset).astype(o_ref.dtype)


def _sublane_packing(dtype):
    # f32 -> 8 rows/vreg, bf16 -> 16, int8/fp8 -> 32.
    itemsize = jnp.dtype(dtype).itemsize
    return 8 * max(1, 4 // itemsize)


def _vmem_capacity_bytes():
    # Trace-time hardware query; fall back to the smallest per-TC VMEM (v7x).
    try:
        return int(pltpu.get_tpu_info().vmem_capacity_bytes)
    except Exception:
        return 64 * 1024 * 1024


def layer_normalization(x, alpha, bias, *, tile_rows=None, target_block_bytes=None):
    """x: (..., hidden). alpha, bias: shape (1,) scalars."""
    orig_shape = x.shape
    hidden = orig_shape[-1]
    x2d = x.reshape(-1, hidden)
    rows = x2d.shape[0]

    packing = _sublane_packing(x.dtype)
    itemsize = jnp.dtype(x.dtype).itemsize

    vmem_cap = _vmem_capacity_bytes()
    if target_block_bytes is None:
        # ~4 MiB slabs on 128 MiB-VMEM chips (v5e/v6e), ~2 MiB on v7x (64 MiB).
        target_block_bytes = (4 if vmem_cap >= 100 * 1024 * 1024 else 2) * 1024 * 1024

    if tile_rows is None:
        # Size the per-step slab to amortize the ~0.35us/grid-step overhead
        # while keeping double-buffered in+out tiles (+ f32 temps) in VMEM.
        tile_rows = max(packing, target_block_bytes // max(1, hidden * itemsize))
    # Align to sublane packing, and never exceed the (aligned) row count.
    tile_rows = max(packing, (tile_rows // packing) * packing)
    rows_aligned = pl.cdiv(rows, packing) * packing
    tile_rows = min(tile_rows, rows_aligned)

    # Ensure >= 2 grid steps when possible so the "parallel" axis can split
    # across v7x's 2 TensorCores (no-op on single-TC v5e/v6e).
    half_rows = (rows_aligned // (2 * packing)) * packing
    if half_rows >= packing:
        tile_rows = min(tile_rows, half_rows)

    # Ragged final block: no host-side padding / slicing. LN is row-wise, so
    # any padded tail rows compute garbage that is never written back.
    grid = (pl.cdiv(rows, tile_rows),)

    # Double-buffered input + output slabs plus headroom for f32 compute temps,
    # capped to the chip's actual VMEM budget (v7x has only 64 MiB per TC).
    block_bytes = tile_rows * hidden * itemsize
    vmem_limit = int(min(int(0.75 * vmem_cap),
                         max(32 * 1024 * 1024, 8 * block_bytes)))

    out = pl.pallas_call(
        _layernorm_kernel,
        out_shape=jax.ShapeDtypeStruct((rows, hidden), x.dtype),
        grid=grid,
        in_specs=[
            pl.BlockSpec(memory_space=pltpu.MemorySpace.SMEM),  # alpha
            pl.BlockSpec(memory_space=pltpu.MemorySpace.SMEM),  # bias
            pl.BlockSpec((tile_rows, hidden), lambda i: (i, 0)),
        ],
        out_specs=pl.BlockSpec((tile_rows, hidden), lambda i: (i, 0)),
        compiler_params=pltpu.CompilerParams(
            dimension_semantics=("parallel",),
            vmem_limit_bytes=vmem_limit,
        ),
    )(alpha, bias, x2d)

    return out.reshape(orig_shape)


def _reference(x, alpha, bias):
    xf = x.astype(jnp.float32)
    mean = jnp.mean(xf, axis=-1, keepdims=True)
    std = jnp.std(xf, axis=-1, keepdims=True, ddof=1)
    return (alpha * (xf - mean) / (std + EPS) + bias).astype(x.dtype)


if __name__ == "__main__":
    key = jax.random.PRNGKey(0)
    batch, seq, hidden = 2, 8, 32
    x = jax.random.normal(key, (batch, seq, hidden), dtype=jnp.float32)

    # Deterministic parameter init matching nn.Parameter(torch.ones(1)/zeros(1)).
    alpha = jnp.ones((1,), dtype=jnp.float32)
    bias = jnp.zeros((1,), dtype=jnp.float32)

    out = layer_normalization(x, alpha, bias)
    jax.block_until_ready(out)

    ref = _reference(x, alpha, bias)
    assert out.shape == x.shape
    assert jnp.allclose(out, ref, atol=1e-5, rtol=1e-5), "mismatch vs reference"

    print("KERNEL_OK")
</pallas_src>

<mosaic_0001>
module attributes {stable_mosaic.version = 11 : i64} {
  func.func @_layernorm_kernel(%arg0: i32, %arg1: memref<1xf32, #tpu.memory_space<smem>>, %arg2: memref<1xf32, #tpu.memory_space<smem>>, %arg3: memref<8x32xf32, #tpu.memory_space<vmem>>, %arg4: memref<8x32xf32, #tpu.memory_space<vmem>>) attributes {dimension_semantics = [#tpu.dimension_semantics<parallel>], iteration_bounds = array<i64: 2>, scalar_prefetch = 0 : i64, scratch_operands = 0 : i64, tpu.core_type = #tpu.core_type<tc>, window_params = [{transform_indices = @transform_0, window_bounds = array<i64: 1>}, {transform_indices = @transform_1, window_bounds = array<i64: 1>}, {transform_indices = @transform_2, window_bounds = array<i64: 8, 32>}, {transform_indices = @transform_3, window_bounds = array<i64: 8, 32>}]} {
    %c0 = arith.constant 0 : index
    %c0_0 = arith.constant 0 : index
    %0 = vector.load %arg3[%c0, %c0_0] : memref<8x32xf32, #tpu.memory_space<vmem>>, vector<8x32xf32>
    %cst = arith.constant dense<0.000000e+00> : vector<8xf32>
    %1 = vector.multi_reduction <add>, %0, %cst [1] : vector<8x32xf32> to vector<8xf32>
    %2 = vector.shape_cast %1 : vector<8xf32> to vector<8x1xf32>
    %cst_1 = arith.constant 3.200000e+01 : f32
    %3 = vector.broadcast %cst_1 : f32 to vector<8x1xf32>
    %4 = arith.divf %2, %3 : vector<8x1xf32>
    %5 = vector.broadcast %4 : vector<8x1xf32> to vector<8x32xf32>
    %6 = arith.subf %0, %5 : vector<8x32xf32>
    %7 = arith.mulf %6, %6 : vector<8x32xf32>
    %cst_2 = arith.constant dense<0.000000e+00> : vector<8xf32>
    %8 = vector.multi_reduction <add>, %7, %cst_2 [1] : vector<8x32xf32> to vector<8xf32>
    %9 = vector.shape_cast %8 : vector<8xf32> to vector<8x1xf32>
    %cst_3 = arith.constant 3.100000e+01 : f32
    %10 = vector.broadcast %cst_3 : f32 to vector<8x1xf32>
    %11 = arith.divf %9, %10 : vector<8x1xf32>
    %12 = math.sqrt %11 : vector<8x1xf32>
    %cst_4 = arith.constant 9.99999997E-7 : f32
    %13 = vector.broadcast %cst_4 : f32 to vector<8x1xf32>
    %14 = arith.addf %12, %13 : vector<8x1xf32>
    %cst_5 = arith.constant 1.000000e+00 : f32
    %15 = vector.broadcast %cst_5 : f32 to vector<8x1xf32>
    %16 = arith.divf %15, %14 : vector<8x1xf32>
    %c0_6 = arith.constant 0 : index
    %17 = memref.load %arg1[%c0_6] : memref<1xf32, #tpu.memory_space<smem>>
    %18 = vector.broadcast %17 : f32 to vector<8x1xf32>
    %19 = arith.mulf %18, %16 : vector<8x1xf32>
    %c0_7 = arith.constant 0 : index
    %20 = memref.load %arg2[%c0_7] : memref<1xf32, #tpu.memory_space<smem>>
    %21 = arith.mulf %4, %19 : vector<8x1xf32>
    %22 = vector.broadcast %20 : f32 to vector<8x1xf32>
    %23 = arith.subf %22, %21 : vector<8x1xf32>
    %24 = vector.broadcast %19 : vector<8x1xf32> to vector<8x32xf32>
    %25 = arith.mulf %0, %24 : vector<8x32xf32>
    %26 = vector.broadcast %23 : vector<8x1xf32> to vector<8x32xf32>
    %27 = arith.addf %25, %26 : vector<8x32xf32>
    %c0_8 = arith.constant 0 : index
    %c0_9 = arith.constant 0 : index
    %28 = vector.load %arg4[%c0_8, %c0_9] : memref<8x32xf32, #tpu.memory_space<vmem>>, vector<8x32xf32>
    tpu.vector_store %arg4[%c0_8, %c0_9], %27 {strides = array<i32>} : memref<8x32xf32, #tpu.memory_space<vmem>>, vector<8x32xf32>,
    return
  }
  func.func @transform_0(%arg0: i32) -> i32 {
    %c0_i32 = arith.constant 0 : i32
    %c0_i32_0 = arith.constant 0 : i32
    return %c0_i32 : i32
  }
  func.func @transform_1(%arg0: i32) -> i32 {
    %c0_i32 = arith.constant 0 : i32
    %c0_i32_0 = arith.constant 0 : i32
    return %c0_i32 : i32
  }
  func.func @transform_2(%arg0: i32) -> (i32, i32) {
    %c0_i32 = arith.constant 0 : i32
    %c0_i32_0 = arith.constant 0 : i32
    return %arg0, %c0_i32 : i32, i32
  }
  func.func @transform_3(%arg0: i32) -> (i32, i32) {
    %c0_i32 = arith.constant 0 : i32
    %c0_i32_0 = arith.constant 0 : i32
    return %arg0, %c0_i32 : i32, i32
  }
}

</mosaic_0001>

<bundles_post_ra>
// kernel: tpu_custom_call.1
= control target key start
LH: loop header
LB: loop body
LE: loop exit
PB: predicated region body
PF: predicated region fallthrough
CT: control target
= control target key end

     0   :  { %s662_s0 = inlined_call_operand.<no memory space> [shape: f32[1], index: 0, kind: input, shape index: {}]   ;;  %s663_s1 = inlined_call_operand.<no memory space> [shape: f32[1], index: 1, kind: input, shape index: {}]   ;;  %s664_s2 = inlined_call_operand.hbm [shape: f32[16,32], index: 2, kind: input, shape index: {}]   ;;  %s665_s3 = inlined_call_operand.hbm [shape: f32[16,32], index: 3, kind: output, shape index: {}]  }
   0x1   :  { %8 = sst [smem:[#allocation2]] %s662_s0 }
   0x2   :  { %9 = sst [smem:[#allocation3]] %s663_s1 }
   0x3   :  { %10 = vsyncpa [#allocation5], 0 }
   0x4   :  { %12 = vsyncpa [#allocation5 + $0x1], 0 }
   0x5   :  { %13 = vsyncpa [#allocation6], 0 }
   0x6   :  { %15 = vsyncpa [#allocation6 + $0x1], 0  ;;  %s494_s16 = smov 0   ;;  %s496_s17 = smov 0  }
   0x7   :  { %s498_s18 = smov 0   ;;  %s500_s19 = smov 0  }
   0x8 LB: > { %s515_s0 = sadd.s32 4294967295, %s464_s19   ;;  %s306_s1 = sadd.s32 4294967294, %s464_s19   ;;  %s464_s19 = sphi %s500_s19, %s680_s19   ;;  %s460_s18 = sphi %s498_s18, %s679_s18   ;;  %s456_s17 = sphi %s496_s17, %s678_s17   ;;  %s452_s16 = sphi %s494_s16, %s677_s16  }
   0x9   : > { %s519_s20 = sadd.s32 1, %s464_s19   ;;  %s70_s21 = sadd.s32 1, %s460_s18 }
   0xa   : > { %s67_s22 = ssub.s32 %s464_s19, %s519_s20  ;;  %p77_p0 = scmp.ne.s32.totalorder %s460_s18, %s456_s17 }
   0xb   : > { %p68_p1 = scmp.eq.s32.totalorder %s67_s22, 0  ;;  %p78_p2 = scmp.eq.s32.totalorder %s464_s19, 0 }
   0xc   : > { %p83_p3 = scmp.ne.s32.totalorder %s456_s17, %s452_s16  ;;  %p84_p4 = scmp.eq.s32.totalorder %s515_s0, 0 }
   0xd   : > { %s531_s23 = scalar_select %p68_p1, %s460_s18, %s70_s21  }
   0xe   : > { %p533_p5 = por %p78_p2, %p77_p0  ;;  %p537_p6 = por %p84_p4, %p83_p3 }
   0xf   : > { %p107_p7 = scmp.eq.s32.totalorder %s515_s0, 1  ;;  %p113_p8 = scmp.eq.s32.totalorder %s306_s1, 1 }
  0x10   : > { %p330_p10 = scmp.lt.s32.totalorder %s464_s19, 2  ;;  %s139_s28 = sand.u32 1, %s460_s18  }
  0x11   : > { %p544_p11 = por %p107_p7, %p77_p0  ;;  %p548_p12 = por %p113_p8, %p83_p3 }
  0x12   : > { %s310_s29 = sshll.u32 %s464_s19, 7  ;;  %s309_s30 = sshll.u32 %s139_s28, 3 }
  0x13   : > { %s669_s26 = scalar_select %p544_p11, 1, 0 }
  0x14   : > { %s670_s27 = scalar_select %p548_p12, 1, 0 }
  0x15   : > { %s557_s6 = scalar_lea.hbm %s664_s2, %s310_s29  ;;  %s143_s7 = scalar_lea.vmem [#allocation4], %s309_s30 }
  0x16   : > { %s150_s8 = sshll.u32 %s143_s7, 4  ;;  %p561_p13 = pnand %p330_p10, %p533_p5  ;;  %s565_s8 = int_to_ptr.vmem [resolvable:$true] %s150_s8 }
  0x17   : > { %s140_s10 = scalar_lea.sflag [#allocation5], %s139_s28  ;;  %s368_s11 = scalar_lea.hbm %s557_s6, 128 }
  0x18   : > { %p369_p2 = scmp.ne.s32.totalorder %s557_s6, %s368_s11  ;;  %p370_p3 = pneg %p561_p13 }
  0x19   : > { %s373_s14 = scalar_lea.hbm %s664_s2, 256  ;;  %p374_p5 = scmp.lt.u32.totalorder %s557_s6, %s664_s2 }
  0x1a   : > { %p371_p4 = pnand %p370_p3, %p369_p2  ;;  %p375_p8 = scmp.lt.u32.totalorder %s373_s14, %s368_s11 }
  0x1b   : > { %p377_p9 = scmp.lt.u32.totalorder %s368_s11, %s557_s6 }
  0x1c   : > { %p372_p7 = pneg %p371_p4  ;;  %p376_p10 = por %p375_p8, %p374_p5 }
  0x1e   : > { %p378_p0 = por %p377_p9, %p376_p10 }
  0x20   : > { %p379_p1 = pnand %p378_p0, %p372_p7 }
  0x22   : > { %382 = shalt.err (!%p379_p1)
}
  0x23   : > { %s383_s21 = scalar_lea.vmem %s565_s8, 128  ;;  %s466_s22 = smov [#allocation4]  }
  0x24   : > { %p384_p2 = scmp.ne.s32.totalorder %s565_s8, %s383_s21  ;;  %s388_s24 = sshll.u32 %s466_s22, 4  ;;  %s389_s24 = int_to_ptr.vmem [resolvable:$false] %s388_s24 }
  0x25   : > { %s390_s28 = scalar_lea.vmem %s389_s24, 256  ;;  %p391_p11 = scmp.lt.s32.totalorder %s565_s8, %s389_s24 }
  0x26   : > { %p386_p4 = pnand %p384_p2, %p370_p3  ;;  %p392_p5 = scmp.lt.s32.totalorder %s390_s28, %s383_s21 }
  0x28   : > { %p387_p12 = pneg %p386_p4  ;;  %p393_p8 = por %p392_p5, %p391_p11 }
  0x2a   : > { %p394_p9 = pnand %p393_p8, %p387_p12 }
  0x2c   : > { %397 = shalt.err (!%p394_p9)
}
  0x2d   : > { %325 = dma.hbm_to_vmem [thread:$0]  (!%p561_p13), %s557_s6, 128, %s565_s8, %s140_s10  }
  0x2e   : > { %p672_p0 = scmp.lt.s32.totalorder %s464_s19, 3  ;;  %p673_p1 = scmp.ge.s32.totalorder %s464_s19, 1 }
  0x30   : > { %p156_p3 = pnand %p673_p1, %p672_p0 }
  0x31   : > { %s599_s29 = sand.u32 (!%p156_p3), 1, %s456_s17  }
  0x32   : > { %159 = sbr.rel (%p156_p3) target bundleno = 403 (0x193), region = 32  ;;  %s312_s30 = sshll.u32 (!%p156_p3), %s599_s29, 3 }
  0x33   : > { %s162_s4 = scalar_lea.sflag (!%p156_p3), [#allocation5], %s599_s29  ;;  %s165_s5 = scalar_lea.vmem (!%p156_p3), [#allocation4], %s312_s30 }
  0x39   : > { %443 = dma.done.wait (%p537_p6), %s162_s4, 128  }
  0x3a   : > { %445 = vsyncadd (%p537_p6), %s162_s4, 4294967168  ;;  %vm189_vm0 = vcmask 261120   ;;  %v188_v0 = vld [vmem:[%s165_s5] sm:$0xff]  ;;  %s212_s25 = sld [smem:[#allocation2]]  ;;  %s315_s7 = sshll.u32 %s515_s0, 7 }
  0x3b   : > { %v190_v1 = vsel %vm189_vm0, %v188_v0, 0.0  ;;  %s215_s6 = sld [smem:[#allocation3]]  ;;  %s187_s8 = scalar_lea.vmem [#allocation7], %s312_s30 }
  0x3c   : > { %191 = vadd.xlane.f32.xlu0 %v190_v1  ;;  %s236_s9 = sshll.u32 %s187_s8, 4  ;;  %s617_s12 = scalar_lea.hbm %s665_s3, %s315_s7  ;;  %s619_s9 = int_to_ptr.vmem [resolvable:$true] %s236_s9 }
  0x3d   : > { %s223_s13 = scalar_lea.sflag [#allocation6], %s599_s29  ;;  %s398_s0 = scalar_lea.vmem %s619_s9, 128 }
  0x3e   : > { %p399_p6 = scmp.ne.s32.totalorder %s619_s9, %s398_s0  ;;  %p674_p11 = scmp.ne.s32.totalorder %s669_s26, 0 }
  0x3f   : > { %s467_s14 = smov [#allocation7]  }
  0x40   : > { %v213_v15 = vstv %s212_s25  ;;  %p400_p12 = pnand %p399_p6, %p674_p11  ;;  %s402_s15 = sshll.u32 %s467_s14, 4  ;;  %s403_s15 = int_to_ptr.vmem [resolvable:$false] %s402_s15 }
  0x41   : > { %v217_v18 = vstv %s215_s6  ;;  %s404_s1 = scalar_lea.vmem %s403_s15, 256  ;;  %p405_p7 = scmp.lt.s32.totalorder %s619_s9, %s403_s15 }
  0x42   : > { %p401_p13 = pneg %p400_p12  ;;  %p406_p10 = scmp.lt.s32.totalorder %s404_s1, %s398_s0 }
  0x44   : > { %p407_p2 = por %p406_p10, %p405_p7 }
  0x46   : > { %p408_p4 = pnand %p407_p2, %p401_p13 }
  0xc9   : > { %v192_v2 = vpop.xlane.xlu0 %191 }
  0xca   : > { %v194_v3 = vmul.f32 0.03125, %v192_v2 }
  0xcc   : > { %v195_v4 = vsub.f32 %v188_v0, %v194_v3 }
  0xce   : > { %v196_v5 = vmul.f32 %v195_v4, %v195_v4 }
  0xd0   : > { %v197_v6 = vsel %vm189_vm0, %v196_v5, 0.0 }
  0xd1   : > { %198 = vadd.xlane.f32.xlu0 %v197_v6 }
 0x15e   : > { %v199_v7 = vpop.xlane.xlu0 %198 }
 0x15f   : > { %v201_v8 = vmul.f32 0.032258064, %v199_v7 }
 0x161   : > { %364 = vrsqrt.f32 %v201_v8  ;;  %vm204_vm1 = vcmp.eq.f32.partialorder %v201_v8, inf  ;;  %v207_v11 = vand.u32 2147483648, %v201_v8  ;;  %vm206_vm2 = vcmp.eq.f32.partialorder %v201_v8, 0.0 }
 0x16b   : > { %v365_v9 = vpop.eup %364 }
 0x16c   : > { %v203_v10 = vmul.f32 %v365_v9, %v201_v8 }
 0x16e   : > { %v205_v12 = vsel %vm204_vm1, %v201_v8, %v203_v10 }
 0x16f   : > { %v208_v13 = vsel %vm206_vm2, %v207_v11, %v205_v12 }
 0x170   : > { %v209_v14 = vadd.f32 1e-06, %v208_v13 }
 0x172   : > { %366 = vrcp.f32 %v209_v14 }
 0x17c   : > { %v367_v16 = vpop.eup %366 }
 0x17d   : > { %v214_v17 = vmul.f32 %v367_v16, %v213_v15 }
 0x17f   : > { %v216_v19 = vmul.f32 %v214_v17, %v194_v3  ;;  %v219_v21 = vmul.f32 %v214_v17, %v188_v0 }
 0x181   : > { %v218_v20 = vsub.f32 %v217_v18, %v216_v19 }
 0x183   : > { %v220_v22 = vadd.f32 %v219_v21, %v218_v20 }
 0x185   : > { %221 = vst.msk [vmem:[%s187_s8] sm:$0xff] %vm189_vm0, %v220_v22 }
 0x186   : > { %411 = shalt.err (!%p408_p4)
}
 0x187   : > { %s412_s21 = scalar_lea.hbm %s617_s12, 128  ;;  %s416_s28 = scalar_lea.hbm %s665_s3, 256 }
 0x188   : > { %p413_p5 = scmp.ne.s32.totalorder %s617_s12, %s412_s21  ;;  %p417_p0 = scmp.lt.u32.totalorder %s617_s12, %s665_s3 }
 0x189   : > { %p418_p1 = scmp.lt.u32.totalorder %s416_s28, %s412_s21  ;;  %p420_p6 = scmp.lt.u32.totalorder %s412_s21, %s617_s12 }
 0x18a   : > { %p414_p8 = pnand %p413_p5, %p674_p11 }
 0x18b   : > { %p419_p3 = por %p418_p1, %p417_p0 }
 0x18c   : > { %p415_p9 = pneg %p414_p8 }
 0x18d   : > { %p421_p12 = por %p420_p6, %p419_p3 }
 0x18f   : > { %p422_p13 = pnand %p421_p12, %p415_p9 }
 0x191   : > { %425 = shalt.err (!%p422_p13)
}
 0x192   : > { %320 = dma.vmem_to_hbm [thread:$0]  (%p674_p11), %s619_s9, 128, %s617_s12, %s223_s13  }
 0x193 PF: > { %s248_s4 = sand.u32 1, %s452_s16   ;;  %p675_p7 = scmp.ne.s32.totalorder %s670_s27, 0 }
 0x194   : > { %p676_p10 = scmp.ge.s32.totalorder %s464_s19, 2  ;;  %s249_s5 = scalar_lea.sflag [#allocation6], %s248_s4 }
 0x196   : > { %p327_p2 = pnand %p676_p10, %p675_p7 }
 0x198   : > { %447 = dma.done.wait (!%p327_p2), %s249_s5, 128  }
 0x199   : > { %449 = vsyncadd (!%p327_p2), %s249_s5, 4294967168  ;;  %p18_p4 = scmp.ge.s32.totalorder %s519_s20, 4   ;;  %s677_s16 = smov %s456_s17 }
 0x19a   : > { %s678_s17 = smov %s460_s18  ;;  %s679_s18 = smov %s531_s23 }
 0x19b   : > { %s680_s19 = smov %s519_s20  ;;  %20 = sbr.rel (!%p18_p4) target bundleno = 8 (0x8), region = 77 }
 0x1a2   :  { %254 = vsyncpa [#allocation5], 1 }
 0x1a3   :  { %256 = vsyncpa [#allocation5 + $0x1], 1 }
 0x1a4   :  { %257 = vsyncpa [#allocation6], 1 }
 0x1a5   :  { %259 = vsyncpa [#allocation6 + $0x1], 1 }

</bundles_post_ra>
